<compile_context>
chip_gen: v6e
topology: v6e:2x2x1
jax: 0.10.0
libtpu: 0.0.40
codegen_flags: <defaults>
</compile_context>

<pallas_src>
import functools

import jax
import jax.numpy as jnp
from jax import lax
from jax.experimental import pallas as pl
from jax.experimental.pallas import tpu as pltpu


def _round_up(v, m):
    return ((v + m - 1) // m) * m


def _pick_batch_tile(n, lout, max_lanes=2048):
    """Largest divisor of n whose folded lane width nb*lout stays modest."""
    cap = max(1, max_lanes // lout)
    nb = 1
    for d in range(1, n + 1):
        if n % d == 0 and d <= cap:
            nb = d
    return nb


def _conv_block_kernel(x_ref, w_ref, b_ref, o_ref, col_ref, *,
                       NB, KH, KW, Cin, Wp, stride, dilation, Lout,
                       neg_slope):
    # x_ref:   (NB, Cin, Wflat)      bf16 -- zero-padded samples, spatially flat
    # w_ref:   (Cout, KH*KW*Cin)     bf16 -- tap-major, channel-minor
    # b_ref:   (Cout, 1)             f32
    # o_ref:   (NB, Cout, Lout)
    # col_ref: (KH*KW*Cin, NB*Lout)  bf16 VMEM im2col scratch
    #
    # Build the fused im2col scratch: each shifted slice is read (and
    # lane-rotated) exactly once, then reused by a single matmul whose
    # contraction runs over taps AND channels.
    for nb in range(NB):
        for kh in range(KH):
            for kw in range(KW):
                t = kh * KW + kw
                off = kh * dilation * Wp + kw * dilation
                if stride == 1:
                    xs = x_ref[nb, :, off:off + Lout]
                else:
                    xs = x_ref[nb, :, pl.ds(off, Lout, stride=stride)]
                col_ref[t * Cin:(t + 1) * Cin, nb * Lout:(nb + 1) * Lout] = xs

    # One MXU contraction for all taps, channels and (folded) samples.
    acc = jnp.dot(w_ref[...], col_ref[...],
                  preferred_element_type=jnp.float32)   # (Cout, NB*Lout) f32
    acc = acc + b_ref[...]                              # bias (Cout,1) broadcast
    acc = jnp.where(acc > 0, acc, neg_slope * acc)      # LeakyReLU(0.2), f32
    for nb in range(NB):
        o_ref[nb] = acc[:, nb * Lout:(nb + 1) * Lout].astype(o_ref.dtype)


def conv2d_block_forward(x, weight, bias, *, stride=1, padding=1,
                         conv_padding=0, dilation=1, neg_slope=0.2):
    """x: (N, Cin, H, W) NCHW. weight: (Cout, Cin, KH, KW). bias: (Cout,)."""
    N, Cin, H, W = x.shape
    Cout, _, KH, KW = weight.shape
    pad = padding + conv_padding                 # ZeroPad2d + Conv2d zero pad
    Hp, Wp = H + 2 * pad, W + 2 * pad
    keh = dilation * (KH - 1) + 1
    kew = dilation * (KW - 1) + 1
    Ho = (Hp - keh) // stride + 1
    Wo = (Wp - kew) // stride + 1

    # Lane-dense flat output length (full padded rows, rounded to 128 lanes);
    # valid outputs sit at flat index ho*Wp + wo (wo < Wo).
    Lout = _round_up(Ho * Wp, 128)
    # Largest flat input index any tap may touch -> pad so reads stay in-bounds.
    max_read = dilation * (KH - 1) * Wp + dilation * (KW - 1) + stride * (Lout - 1)
    Wflat = _round_up(max_read + 1, 128)

    # Samples folded per grid step (whole small batch -> one step / one matmul).
    NB = _pick_batch_tile(N, Lout)

    # --- cheap wrapper-side layout work (~1x input, no 9x im2col in HBM) ---
    x_pad = jnp.pad(x, ((0, 0), (0, 0), (pad, pad), (pad, pad)))
    x_flat = x_pad.reshape(N, Cin, Hp * Wp)
    x_flat = jnp.pad(x_flat, ((0, 0), (0, 0), (0, Wflat - Hp * Wp)))
    x_flat = x_flat.astype(jnp.bfloat16)         # bf16 operands, f32 accumulate

    # Tap-major, channel-minor weight matrix matching im2col scratch rows:
    # row t*Cin + c  <->  weight[cout, c, kh, kw] with t = kh*KW + kw.
    w_r = weight.transpose(0, 2, 3, 1).reshape(Cout, KH * KW * Cin)
    w_r = w_r.astype(jnp.bfloat16)
    b_r = bias.reshape(Cout, 1).astype(jnp.float32)

    kernel = functools.partial(
        _conv_block_kernel, NB=NB, KH=KH, KW=KW, Cin=Cin, Wp=Wp,
        stride=stride, dilation=dilation, Lout=Lout, neg_slope=neg_slope)

    out_flat = pl.pallas_call(
        kernel,
        out_shape=jax.ShapeDtypeStruct((N, Cout, Lout), x.dtype),
        grid_spec=pltpu.PrefetchScalarGridSpec(
            num_scalar_prefetch=0,
            grid=(N // NB,),
            in_specs=[
                pl.BlockSpec((NB, Cin, Wflat), lambda i: (i, 0, 0)),
                pl.BlockSpec((Cout, KH * KW * Cin), lambda i: (0, 0)),
                pl.BlockSpec((Cout, 1), lambda i: (0, 0)),
            ],
            out_specs=pl.BlockSpec((NB, Cout, Lout), lambda i: (i, 0, 0)),
            scratch_shapes=[
                pltpu.VMEM((KH * KW * Cin, NB * Lout), jnp.bfloat16)],
        ),
        compiler_params=pltpu.CompilerParams(
            dimension_semantics=("parallel",)),
    )(x_flat, w_r, b_r)

    # Valid outputs are at flat index ho*Wp + wo; pure slice + reshape,
    # no transpose.  (Output kept in x.dtype to match the PyTorch module.)
    out = out_flat[:, :, :Ho * Wp].reshape(N, Cout, Ho, Wp)[:, :, :, :Wo]
    return out


def _reference(x, weight, bias, *, stride=1, padding=1, neg_slope=0.2):
    # bf16-cast operands / f32 accumulation, matching the kernel's numerics.
    y = lax.conv_general_dilated(
        x.astype(jnp.bfloat16), weight.astype(jnp.bfloat16),
        window_strides=(stride, stride),
        padding=((padding, padding), (padding, padding)),
        dimension_numbers=("NCHW", "OIHW", "NCHW"),
        preferred_element_type=jnp.float32)
    y = y + bias.reshape(1, -1, 1, 1)
    return jnp.where(y > 0, y, neg_slope * y)


if __name__ == "__main__":
    key = jax.random.PRNGKey(0)
    kx, kw, kb = jax.random.split(key, 3)

    N, Cin, H, W = 2, 4, 16, 16
    Cout, KH, KW = 8, 3, 3
    stride, padding = 1, 1

    x = jax.random.normal(kx, (N, Cin, H, W), dtype=jnp.float32)
    weight = jax.random.normal(kw, (Cout, Cin, KH, KW), dtype=jnp.float32) * 0.1
    bias = jax.random.normal(kb, (Cout,), dtype=jnp.float32) * 0.1

    y = conv2d_block_forward(x, weight, bias, stride=stride, padding=padding)
    y = jax.block_until_ready(y)

    y_ref = _reference(x, weight, bias, stride=stride, padding=padding)
    assert y.shape == (N, Cout, H, W), y.shape
    assert jnp.allclose(y, y_ref, atol=2e-2, rtol=2e-2), "mismatch vs reference"

    print("KERNEL_OK")
</pallas_src>

<mosaic_0001>
module attributes {stable_mosaic.version = 11 : i64} {
  func.func @_conv_block_kernel(%arg0: i32, %arg1: memref<2x4x512xbf16, #tpu.memory_space<vmem>>, %arg2: memref<8x36xbf16, #tpu.memory_space<vmem>>, %arg3: memref<8x1xf32, #tpu.memory_space<vmem>>, %arg4: memref<2x8x384xf32, #tpu.memory_space<vmem>>, %arg5: memref<36x768xbf16, #tpu.memory_space<vmem>>) attributes {dimension_semantics = [#tpu.dimension_semantics<parallel>], iteration_bounds = array<i64: 1>, scalar_prefetch = 0 : i64, scratch_operands = 1 : i64, tpu.core_type = #tpu.core_type<tc>, window_params = [{transform_indices = @transform_0, window_bounds = array<i64: 2, 4, 512>}, {pipeline_mode = #tpu.pipeline_mode<synchronous>, transform_indices = @transform_1, window_bounds = array<i64: 8, 36>}, {pipeline_mode = #tpu.pipeline_mode<synchronous>, transform_indices = @transform_2, window_bounds = array<i64: 8, 1>}, {transform_indices = @transform_3, window_bounds = array<i64: 2, 8, 384>}]} {
    %c0 = arith.constant 0 : index
    %c0_0 = arith.constant 0 : index
    %c0_1 = arith.constant 0 : index
    %0 = vector.load %arg1[%c0, %c0_0, %c0_1] : memref<2x4x512xbf16, #tpu.memory_space<vmem>>, vector<1x4x384xbf16>
    %1 = vector.shape_cast %0 : vector<1x4x384xbf16> to vector<4x384xbf16>
    %c0_2 = arith.constant 0 : index
    %c0_3 = arith.constant 0 : index
    %2 = vector.load %arg5[%c0_2, %c0_3] : memref<36x768xbf16, #tpu.memory_space<vmem>>, vector<4x384xbf16>
    tpu.vector_store %arg5[%c0_2, %c0_3], %1 {strides = array<i32>} : memref<36x768xbf16, #tpu.memory_space<vmem>>, vector<4x384xbf16>,
    %c0_4 = arith.constant 0 : index
    %c0_5 = arith.constant 0 : index
    %c1 = arith.constant 1 : index
    %3 = vector.load %arg1[%c0_4, %c0_5, %c1] : memref<2x4x512xbf16, #tpu.memory_space<vmem>>, vector<1x4x384xbf16>
    %4 = vector.shape_cast %3 : vector<1x4x384xbf16> to vector<4x384xbf16>
    %c4 = arith.constant 4 : index
    %c0_6 = arith.constant 0 : index
    %5 = vector.load %arg5[%c4, %c0_6] : memref<36x768xbf16, #tpu.memory_space<vmem>>, vector<4x384xbf16>
    tpu.vector_store %arg5[%c4, %c0_6], %4 {strides = array<i32>} : memref<36x768xbf16, #tpu.memory_space<vmem>>, vector<4x384xbf16>,
    %c0_7 = arith.constant 0 : index
    %c0_8 = arith.constant 0 : index
    %c2 = arith.constant 2 : index
    %6 = vector.load %arg1[%c0_7, %c0_8, %c2] : memref<2x4x512xbf16, #tpu.memory_space<vmem>>, vector<1x4x384xbf16>
    %7 = vector.shape_cast %6 : vector<1x4x384xbf16> to vector<4x384xbf16>
    %c8 = arith.constant 8 : index
    %c0_9 = arith.constant 0 : index
    %8 = vector.load %arg5[%c8, %c0_9] : memref<36x768xbf16, #tpu.memory_space<vmem>>, vector<4x384xbf16>
    tpu.vector_store %arg5[%c8, %c0_9], %7 {strides = array<i32>} : memref<36x768xbf16, #tpu.memory_space<vmem>>, vector<4x384xbf16>,
    %c0_10 = arith.constant 0 : index
    %c0_11 = arith.constant 0 : index
    %c18 = arith.constant 18 : index
    %9 = vector.load %arg1[%c0_10, %c0_11, %c18] : memref<2x4x512xbf16, #tpu.memory_space<vmem>>, vector<1x4x384xbf16>
    %10 = vector.shape_cast %9 : vector<1x4x384xbf16> to vector<4x384xbf16>
    %c12 = arith.constant 12 : index
    %c0_12 = arith.constant 0 : index
    %11 = vector.load %arg5[%c12, %c0_12] : memref<36x768xbf16, #tpu.memory_space<vmem>>, vector<4x384xbf16>
    tpu.vector_store %arg5[%c12, %c0_12], %10 {strides = array<i32>} : memref<36x768xbf16, #tpu.memory_space<vmem>>, vector<4x384xbf16>,
    %c0_13 = arith.constant 0 : index
    %c0_14 = arith.constant 0 : index
    %c19 = arith.constant 19 : index
    %12 = vector.load %arg1[%c0_13, %c0_14, %c19] : memref<2x4x512xbf16, #tpu.memory_space<vmem>>, vector<1x4x384xbf16>
    %13 = vector.shape_cast %12 : vector<1x4x384xbf16> to vector<4x384xbf16>
    %c16 = arith.constant 16 : index
    %c0_15 = arith.constant 0 : index
    %14 = vector.load %arg5[%c16, %c0_15] : memref<36x768xbf16, #tpu.memory_space<vmem>>, vector<4x384xbf16>
    tpu.vector_store %arg5[%c16, %c0_15], %13 {strides = array<i32>} : memref<36x768xbf16, #tpu.memory_space<vmem>>, vector<4x384xbf16>,
    %c0_16 = arith.constant 0 : index
    %c0_17 = arith.constant 0 : index
    %c20 = arith.constant 20 : index
    %15 = vector.load %arg1[%c0_16, %c0_17, %c20] : memref<2x4x512xbf16, #tpu.memory_space<vmem>>, vector<1x4x384xbf16>
    %16 = vector.shape_cast %15 : vector<1x4x384xbf16> to vector<4x384xbf16>
    %c20_18 = arith.constant 20 : index
    %c0_19 = arith.constant 0 : index
    %17 = vector.load %arg5[%c20_18, %c0_19] : memref<36x768xbf16, #tpu.memory_space<vmem>>, vector<4x384xbf16>
    tpu.vector_store %arg5[%c20_18, %c0_19], %16 {strides = array<i32>} : memref<36x768xbf16, #tpu.memory_space<vmem>>, vector<4x384xbf16>,
    %c0_20 = arith.constant 0 : index
    %c0_21 = arith.constant 0 : index
    %c36 = arith.constant 36 : index
    %18 = vector.load %arg1[%c0_20, %c0_21, %c36] : memref<2x4x512xbf16, #tpu.memory_space<vmem>>, vector<1x4x384xbf16>
    %19 = vector.shape_cast %18 : vector<1x4x384xbf16> to vector<4x384xbf16>
    %c24 = arith.constant 24 : index
    %c0_22 = arith.constant 0 : index
    %20 = vector.load %arg5[%c24, %c0_22] : memref<36x768xbf16, #tpu.memory_space<vmem>>, vector<4x384xbf16>
    tpu.vector_store %arg5[%c24, %c0_22], %19 {strides = array<i32>} : memref<36x768xbf16, #tpu.memory_space<vmem>>, vector<4x384xbf16>,
    %c0_23 = arith.constant 0 : index
    %c0_24 = arith.constant 0 : index
    %c37 = arith.constant 37 : index
    %21 = vector.load %arg1[%c0_23, %c0_24, %c37] : memref<2x4x512xbf16, #tpu.memory_space<vmem>>, vector<1x4x384xbf16>
    %22 = vector.shape_cast %21 : vector<1x4x384xbf16> to vector<4x384xbf16>
    %c28 = arith.constant 28 : index
    %c0_25 = arith.constant 0 : index
    %23 = vector.load %arg5[%c28, %c0_25] : memref<36x768xbf16, #tpu.memory_space<vmem>>, vector<4x384xbf16>
    tpu.vector_store %arg5[%c28, %c0_25], %22 {strides = array<i32>} : memref<36x768xbf16, #tpu.memory_space<vmem>>, vector<4x384xbf16>,
    %c0_26 = arith.constant 0 : index
    %c0_27 = arith.constant 0 : index
    %c38 = arith.constant 38 : index
    %24 = vector.load %arg1[%c0_26, %c0_27, %c38] : memref<2x4x512xbf16, #tpu.memory_space<vmem>>, vector<1x4x384xbf16>
    %25 = vector.shape_cast %24 : vector<1x4x384xbf16> to vector<4x384xbf16>
    %c32 = arith.constant 32 : index
    %c0_28 = arith.constant 0 : index
    %26 = vector.load %arg5[%c32, %c0_28] : memref<36x768xbf16, #tpu.memory_space<vmem>>, vector<4x384xbf16>
    tpu.vector_store %arg5[%c32, %c0_28], %25 {strides = array<i32>} : memref<36x768xbf16, #tpu.memory_space<vmem>>, vector<4x384xbf16>,
    %c1_29 = arith.constant 1 : index
    %c0_30 = arith.constant 0 : index
    %c0_31 = arith.constant 0 : index
    %27 = vector.load %arg1[%c1_29, %c0_30, %c0_31] : memref<2x4x512xbf16, #tpu.memory_space<vmem>>, vector<1x4x384xbf16>
    %28 = vector.shape_cast %27 : vector<1x4x384xbf16> to vector<4x384xbf16>
    %c0_32 = arith.constant 0 : index
    %c384 = arith.constant 384 : index
    %29 = vector.load %arg5[%c0_32, %c384] : memref<36x768xbf16, #tpu.memory_space<vmem>>, vector<4x384xbf16>
    tpu.vector_store %arg5[%c0_32, %c384], %28 {strides = array<i32>} : memref<36x768xbf16, #tpu.memory_space<vmem>>, vector<4x384xbf16>,
    %c1_33 = arith.constant 1 : index
    %c0_34 = arith.constant 0 : index
    %c1_35 = arith.constant 1 : index
    %30 = vector.load %arg1[%c1_33, %c0_34, %c1_35] : memref<2x4x512xbf16, #tpu.memory_space<vmem>>, vector<1x4x384xbf16>
    %31 = vector.shape_cast %30 : vector<1x4x384xbf16> to vector<4x384xbf16>
    %c4_36 = arith.constant 4 : index
    %c384_37 = arith.constant 384 : index
    %32 = vector.load %arg5[%c4_36, %c384_37] : memref<36x768xbf16, #tpu.memory_space<vmem>>, vector<4x384xbf16>
    tpu.vector_store %arg5[%c4_36, %c384_37], %31 {strides = array<i32>} : memref<36x768xbf16, #tpu.memory_space<vmem>>, vector<4x384xbf16>,
    %c1_38 = arith.constant 1 : index
    %c0_39 = arith.constant 0 : index
    %c2_40 = arith.constant 2 : index
    %33 = vector.load %arg1[%c1_38, %c0_39, %c2_40] : memref<2x4x512xbf16, #tpu.memory_space<vmem>>, vector<1x4x384xbf16>
    %34 = vector.shape_cast %33 : vector<1x4x384xbf16> to vector<4x384xbf16>
    %c8_41 = arith.constant 8 : index
    %c384_42 = arith.constant 384 : index
    %35 = vector.load %arg5[%c8_41, %c384_42] : memref<36x768xbf16, #tpu.memory_space<vmem>>, vector<4x384xbf16>
    tpu.vector_store %arg5[%c8_41, %c384_42], %34 {strides = array<i32>} : memref<36x768xbf16, #tpu.memory_space<vmem>>, vector<4x384xbf16>,
    %c1_43 = arith.constant 1 : index
    %c0_44 = arith.constant 0 : index
    %c18_45 = arith.constant 18 : index
    %36 = vector.load %arg1[%c1_43, %c0_44, %c18_45] : memref<2x4x512xbf16, #tpu.memory_space<vmem>>, vector<1x4x384xbf16>
    %37 = vector.shape_cast %36 : vector<1x4x384xbf16> to vector<4x384xbf16>
    %c12_46 = arith.constant 12 : index
    %c384_47 = arith.constant 384 : index
    %38 = vector.load %arg5[%c12_46, %c384_47] : memref<36x768xbf16, #tpu.memory_space<vmem>>, vector<4x384xbf16>
    tpu.vector_store %arg5[%c12_46, %c384_47], %37 {strides = array<i32>} : memref<36x768xbf16, #tpu.memory_space<vmem>>, vector<4x384xbf16>,
    %c1_48 = arith.constant 1 : index
    %c0_49 = arith.constant 0 : index
    %c19_50 = arith.constant 19 : index
    %39 = vector.load %arg1[%c1_48, %c0_49, %c19_50] : memref<2x4x512xbf16, #tpu.memory_space<vmem>>, vector<1x4x384xbf16>
    %40 = vector.shape_cast %39 : vector<1x4x384xbf16> to vector<4x384xbf16>
    %c16_51 = arith.constant 16 : index
    %c384_52 = arith.constant 384 : index
    %41 = vector.load %arg5[%c16_51, %c384_52] : memref<36x768xbf16, #tpu.memory_space<vmem>>, vector<4x384xbf16>
    tpu.vector_store %arg5[%c16_51, %c384_52], %40 {strides = array<i32>} : memref<36x768xbf16, #tpu.memory_space<vmem>>, vector<4x384xbf16>,
    %c1_53 = arith.constant 1 : index
    %c0_54 = arith.constant 0 : index
    %c20_55 = arith.constant 20 : index
    %42 = vector.load %arg1[%c1_53, %c0_54, %c20_55] : memref<2x4x512xbf16, #tpu.memory_space<vmem>>, vector<1x4x384xbf16>
    %43 = vector.shape_cast %42 : vector<1x4x384xbf16> to vector<4x384xbf16>
    %c20_56 = arith.constant 20 : index
    %c384_57 = arith.constant 384 : index
    %44 = vector.load %arg5[%c20_56, %c384_57] : memref<36x768xbf16, #tpu.memory_space<vmem>>, vector<4x384xbf16>
    tpu.vector_store %arg5[%c20_56, %c384_57], %43 {strides = array<i32>} : memref<36x768xbf16, #tpu.memory_space<vmem>>, vector<4x384xbf16>,
    %c1_58 = arith.constant 1 : index
    %c0_59 = arith.constant 0 : index
    %c36_60 = arith.constant 36 : index
    %45 = vector.load %arg1[%c1_58, %c0_59, %c36_60] : memref<2x4x512xbf16, #tpu.memory_space<vmem>>, vector<1x4x384xbf16>
    %46 = vector.shape_cast %45 : vector<1x4x384xbf16> to vector<4x384xbf16>
    %c24_61 = arith.constant 24 : index
    %c384_62 = arith.constant 384 : index
    %47 = vector.load %arg5[%c24_61, %c384_62] : memref<36x768xbf16, #tpu.memory_space<vmem>>, vector<4x384xbf16>
    tpu.vector_store %arg5[%c24_61, %c384_62], %46 {strides = array<i32>} : memref<36x768xbf16, #tpu.memory_space<vmem>>, vector<4x384xbf16>,
    %c1_63 = arith.constant 1 : index
    %c0_64 = arith.constant 0 : index
    %c37_65 = arith.constant 37 : index
    %48 = vector.load %arg1[%c1_63, %c0_64, %c37_65] : memref<2x4x512xbf16, #tpu.memory_space<vmem>>, vector<1x4x384xbf16>
    %49 = vector.shape_cast %48 : vector<1x4x384xbf16> to vector<4x384xbf16>
    %c28_66 = arith.constant 28 : index
    %c384_67 = arith.constant 384 : index
    %50 = vector.load %arg5[%c28_66, %c384_67] : memref<36x768xbf16, #tpu.memory_space<vmem>>, vector<4x384xbf16>
    tpu.vector_store %arg5[%c28_66, %c384_67], %49 {strides = array<i32>} : memref<36x768xbf16, #tpu.memory_space<vmem>>, vector<4x384xbf16>,
    %c1_68 = arith.constant 1 : index
    %c0_69 = arith.constant 0 : index
    %c38_70 = arith.constant 38 : index
    %51 = vector.load %arg1[%c1_68, %c0_69, %c38_70] : memref<2x4x512xbf16, #tpu.memory_space<vmem>>, vector<1x4x384xbf16>
    %52 = vector.shape_cast %51 : vector<1x4x384xbf16> to vector<4x384xbf16>
    %c32_71 = arith.constant 32 : index
    %c384_72 = arith.constant 384 : index
    %53 = vector.load %arg5[%c32_71, %c384_72] : memref<36x768xbf16, #tpu.memory_space<vmem>>, vector<4x384xbf16>
    tpu.vector_store %arg5[%c32_71, %c384_72], %52 {strides = array<i32>} : memref<36x768xbf16, #tpu.memory_space<vmem>>, vector<4x384xbf16>,
    %c0_73 = arith.constant 0 : index
    %c0_74 = arith.constant 0 : index
    %54 = vector.load %arg2[%c0_73, %c0_74] : memref<8x36xbf16, #tpu.memory_space<vmem>>, vector<8x36xbf16>
    %c0_75 = arith.constant 0 : index
    %c0_76 = arith.constant 0 : index
    %55 = vector.load %arg5[%c0_75, %c0_76] : memref<36x768xbf16, #tpu.memory_space<vmem>>, vector<36x768xbf16>
    %cst = arith.constant dense<0.000000e+00> : vector<8x768xf32>
    %56 = tpu.matmul %54, %55, %cst {dimension_numbers = #tpu.dot_dimension_numbers<[1], [0], [0], [1], [0, 0, 1, 1], [], []>} : vector<8x36xbf16>, vector<36x768xbf16>, vector<8x768xf32> -> vector<8x768xf32>
    %c0_77 = arith.constant 0 : index
    %c0_78 = arith.constant 0 : index
    %57 = vector.load %arg3[%c0_77, %c0_78] : memref<8x1xf32, #tpu.memory_space<vmem>>, vector<8x1xf32>
    %58 = vector.broadcast %57 : vector<8x1xf32> to vector<8x768xf32>
    %59 = arith.addf %56, %58 : vector<8x768xf32>
    %cst_79 = arith.constant 0.000000e+00 : f32
    %60 = vector.broadcast %cst_79 : f32 to vector<8x768xf32>
    %61 = arith.cmpf ogt, %59, %60 : vector<8x768xf32>
    %cst_80 = arith.constant 2.000000e-01 : f32
    %62 = vector.broadcast %cst_80 : f32 to vector<8x768xf32>
    %63 = arith.mulf %62, %59 : vector<8x768xf32>
    %64 = arith.select %61, %59, %63 : vector<8x768xi1>, vector<8x768xf32>
    %65 = vector.extract_strided_slice %64 {offsets = [0, 0], sizes = [8, 384], strides = [1, 1]} : vector<8x768xf32> to vector<8x384xf32>
    %c0_81 = arith.constant 0 : index
    %c0_82 = arith.constant 0 : index
    %c0_83 = arith.constant 0 : index
    %66 = vector.load %arg4[%c0_81, %c0_82, %c0_83] : memref<2x8x384xf32, #tpu.memory_space<vmem>>, vector<1x8x384xf32>
    %67 = vector.shape_cast %66 : vector<1x8x384xf32> to vector<8x384xf32>
    %68 = vector.shape_cast %65 : vector<8x384xf32> to vector<1x8x384xf32>
    tpu.vector_store %arg4[%c0_81, %c0_82, %c0_83], %68 {strides = array<i32>} : memref<2x8x384xf32, #tpu.memory_space<vmem>>, vector<1x8x384xf32>,
    %69 = vector.extract_strided_slice %64 {offsets = [0, 384], sizes = [8, 384], strides = [1, 1]} : vector<8x768xf32> to vector<8x384xf32>
    %c1_84 = arith.constant 1 : index
    %c0_85 = arith.constant 0 : index
    %c0_86 = arith.constant 0 : index
    %70 = vector.load %arg4[%c1_84, %c0_85, %c0_86] : memref<2x8x384xf32, #tpu.memory_space<vmem>>, vector<1x8x384xf32>
    %71 = vector.shape_cast %70 : vector<1x8x384xf32> to vector<8x384xf32>
    %72 = vector.shape_cast %69 : vector<8x384xf32> to vector<1x8x384xf32>
    tpu.vector_store %arg4[%c1_84, %c0_85, %c0_86], %72 {strides = array<i32>} : memref<2x8x384xf32, #tpu.memory_space<vmem>>, vector<1x8x384xf32>,
    return
  }
  func.func @transform_0(%arg0: i32) -> (i32, i32, i32) {
    %c0_i32 = arith.constant 0 : i32
    %c0_i32_0 = arith.constant 0 : i32
    %c0_i32_1 = arith.constant 0 : i32
    return %arg0, %c0_i32, %c0_i32_0 : i32, i32, i32
  }
  func.func @transform_1(%arg0: i32) -> (i32, i32) {
    %c0_i32 = arith.constant 0 : i32
    %c0_i32_0 = arith.constant 0 : i32
    %c0_i32_1 = arith.constant 0 : i32
    return %c0_i32, %c0_i32_0 : i32, i32
  }
  func.func @transform_2(%arg0: i32) -> (i32, i32) {
    %c0_i32 = arith.constant 0 : i32
    %c0_i32_0 = arith.constant 0 : i32
    %c0_i32_1 = arith.constant 0 : i32
    return %c0_i32, %c0_i32_0 : i32, i32
  }
  func.func @transform_3(%arg0: i32) -> (i32, i32, i32) {
    %c0_i32 = arith.constant 0 : i32
    %c0_i32_0 = arith.constant 0 : i32
    %c0_i32_1 = arith.constant 0 : i32
    return %arg0, %c0_i32, %c0_i32_0 : i32, i32, i32
  }
}

</mosaic_0001>

<bundles_post_ra>
// kernel: tpu_custom_call.1
= control target key start
LH: loop header
LB: loop body
LE: loop exit
PB: predicated region body
PF: predicated region fallthrough
CT: control target
= control target key end

     0   :  { %8 = vsyncpa [#allocation4], 0  ;;  %s1109_s0 = inlined_call_operand.hbm [shape: bf16[2,4,512], index: 0, kind: input, shape index: {}]   ;;  %s1110_s1 = inlined_call_operand.vmem [shape: bf16[8,36], index: 1, kind: input, shape index: {}]   ;;  %s1111_s2 = inlined_call_operand.vmem [shape: f32[8,1], index: 2, kind: input, shape index: {}]   ;;  %s1112_s3 = inlined_call_operand.hbm [shape: f32[2,8,384], index: 3, kind: output, shape index: {}]  }
   0x1   :  { %9 = vsyncpa [#allocation5], 0  ;;  %s963_s12 = smov [#allocation3]  }
   0x2   :  { %s15_s13 = sshll.u32 %s963_s12, 4  ;;  %s16_s13 = int_to_ptr.vmem [resolvable:$true] %s15_s13 }
   0x3   :  { %s927_s14 = scalar_lea.vmem %s16_s13, 256  ;;  %p932_p1 = scmp.lt.s32.totalorder %s16_s13, %s16_s13 }
   0x4   :  { %p928_p0 = scmp.ne.s32.totalorder %s16_s13, %s927_s14  ;;  %p933_p2 = scmp.lt.s32.totalorder %s927_s14, %s927_s14 }
   0x6   :  { %p934_p3 = por %p933_p2, %p932_p1 }
   0x8   :  { %p935_p4 = pnand %p934_p3, %p928_p0 }
   0xa   :  { %938 = shalt.err (!%p935_p4)
}
   0xb   :  { %s964_s15 = smov 128   ;;  %s965_s16 = smov 8  }
   0xc   :  { %21 = dma.hbm_to_vmem [thread:$0]  %s1109_s0, 256, %s16_s13, [#allocation4], %s964_s15, %s964_s15, %s965_s16  }
   0xd   :  { %959 = dma.done.wait [#allocation4], 256  }
   0xe   :  { %960 = vsyncadd [#allocation4], 4294967040  ;;  %v57_v0 = vlaneseq  ;;  %v966_v1 = vmov 1983009808   ;;  %v269_v6 = vld [vmem:[#allocation3] sm:$0xff]  ;;  %s967_s19 = smov 90  }
   0xf   :  { %v55_v2 = vunpack.c.l.s4 %v966_v1  ;;  %v271_v8 = vcombine.high %v269_v6, %v269_v6  ;;  %s968_s20 = smov 109   ;;  %s969_s21 = smov 92   ;;  %v178_v10 = vcombine.low %v269_v6, %v269_v6  ;;  %v30_v12 = vld [vmem:[#allocation3] sm:$0x3f]  ;;  %v532_v13 = vld [vmem:[#allocation3 + $0x8] sm:$0xff]  ;;  %v975_v18 = vmov 0  }
  0x10   :  { %v58_v3 = vshrl.u32 %v57_v0, 7  ;;  %s970_s0 = smov 108   ;;  %847 = vst.sshfl [vmem:[#allocation2] sm:$0xf pattern:$0x76325410] %v30_v12  ;;  %v534_v14 = vcombine.high %v532_v13, %v532_v13  ;;  %v444_v17 = vcombine.low %v532_v13, %v532_v13  ;;  %714 = vmatprep.mubr.bf16.mxu0 %v975_v18  ;;  %755 = vmatprep.mubr.bf16.mxu1 %v975_v18 }
  0x11   :  { %v56_v4 = vunpack.c.0.s8 %v55_v2  ;;  %s971_s22 = smov 91   ;;  %s972_s23 = smov 127   ;;  %891 = vset.pattern.permute.xlu0 %v975_v18  ;;  %v301_v20 = vld [vmem:[#allocation3 + $0x8] sm:$0x3f]  ;;  %v32_v21 = vcombine.high %v30_v12, %v30_v12  ;;  %vm200_vm0 = vcmask 883712   ;;  %vm74_vm1 = vcmask 1043456  }
  0x12   :  { %s973_s24 = smov 126   ;;  %s974_s25 = smov 110   ;;  %849 = vst.sshfl [vmem:[#allocation2 + $0xc] sm:$0xf pattern:$0x76325410] %v301_v20  ;;  %v303_v22 = vcombine.high %v301_v20, %v301_v20 }
  0x13   :  { %v59_v5 = vsub.s32 %v56_v4, %v58_v3  ;;  %848 = vst.sshfl [vmem:[#allocation2 + $0x8] sm:$0x3 pattern:$0x76325410] %v32_v21  ;;  %v578_v23 = vld [vmem:[%s1111_s2] sm:$0xff]  ;;  %vm293_vm2 = vcmask 736256  }
  0x14   :  { %850 = vst.sshfl [vmem:[#allocation2 + $0x14] sm:$0x3 pattern:$0x76325410] %v303_v22  ;;  %vm169_vm3 = vcmask 891904   ;;  %vm231_vm4 = vcmask 752640  }
  0x15   :  { %v278_v7 = vrot.slane %v269_v6, %v59_v5  ;;  %v285_v9 = vrot.slane %v271_v8, %v59_v5  ;;  %v185_v11 = vrot.slane %v178_v10, %v59_v5  ;;  %v548_v15 = vrot.slane %v534_v14, %v59_v5 }
  0x16   :  { %v541_v16 = vrot.slane %v532_v13, %v59_v5  ;;  %v451_v19 = vrot.slane %v444_v17, %v59_v5  ;;  %vm262_vm5 = vcmask 744448   ;;  %vm76_vm6 = vcmask 1039360  }
  0x17   :  { %286 = vrot.lane.b32.xlu0 %v278_v7, %s967_s19  ;;  %162 = vrot.lane.b32.xlu1 %v278_v7, %s968_s20  ;;  %vm663_vm7 = vcmask 1041408   ;;  %vm107_vm8 = vcmask 1031168   ;;  %vm138_vm9 = vcmask 900096   ;;  %vm659_vm10 = vcmask 293888  }
  0x1b   :  { %224 = vrot.lane.b32.xlu0 %v278_v7, %s969_s21  ;;  %195 = vrot.lane.b32.xlu1 %v278_v7, %s970_s0 }
  0x1f   :  { %288 = vrot.lane.b32.xlu0 %v285_v9, %s967_s19  ;;  %164 = vrot.lane.b32.xlu1 %v285_v9, %s968_s20 }
  0x23   :  { %193 = vrot.lane.b32.xlu0 %v185_v11, %s970_s0  ;;  %226 = vrot.lane.b32.xlu1 %v285_v9, %s969_s21 }
  0x27   :  { %255 = vrot.lane.b32.xlu0 %v185_v11, %s971_s22  ;;  %257 = vrot.lane.b32.xlu1 %v278_v7, %s971_s22 }
  0x2b   :  { %70 = vrot.lane.b32.xlu1 %v278_v7, %s972_s23  ;;  %68 = vrot.lane.b32.xlu0 %v185_v11, %s972_s23 }
  0x2f   :  { %102 = vrot.lane.b32.xlu1 %v285_v9, %s973_s24  ;;  %100 = vrot.lane.b32.xlu0 %v278_v7, %s973_s24 }
  0x33   :  { %133 = vrot.lane.b32.xlu1 %v278_v7, %s974_s25  ;;  %131 = vrot.lane.b32.xlu0 %v185_v11, %s974_s25 }
  0x37   :  { %551 = vrot.lane.b32.xlu1 %v548_v15, %s967_s19  ;;  %549 = vrot.lane.b32.xlu0 %v541_v16, %s967_s19 }
  0x3b   :  { %431 = vrot.lane.b32.xlu1 %v548_v15, %s968_s20  ;;  %429 = vrot.lane.b32.xlu0 %v541_v16, %s968_s20 }
  0x3f   :  { %461 = vrot.lane.b32.xlu1 %v541_v16, %s970_s0  ;;  %459 = vrot.lane.b32.xlu0 %v451_v19, %s970_s0 }
  0x43   :  { %491 = vrot.lane.b32.xlu1 %v548_v15, %s969_s21  ;;  %489 = vrot.lane.b32.xlu0 %v541_v16, %s969_s21 }
  0x47   :  { %521 = vrot.lane.b32.xlu1 %v541_v16, %s971_s22  ;;  %519 = vrot.lane.b32.xlu0 %v451_v19, %s971_s22 }
  0x4b   :  { %341 = vrot.lane.b32.xlu1 %v541_v16, %s972_s23  ;;  %339 = vrot.lane.b32.xlu0 %v451_v19, %s972_s23 }
  0x4f   :  { %371 = vrot.lane.b32.xlu1 %v548_v15, %s973_s24  ;;  %369 = vrot.lane.b32.xlu0 %v541_v16, %s973_s24 }
  0x53   :  { %401 = vrot.lane.b32.xlu1 %v541_v16, %s974_s25  ;;  %399 = vrot.lane.b32.xlu0 %v451_v19, %s974_s25 }
  0x57   :  { %581 = vperm.xlu0 %891, %v578_v23  }
  0x89   :  { %v287_v24 = vpop.permute.xlu0 %286  ;;  %v163_v25 = vpop.permute.xlu1 %162 }
  0x8a   :  { %v290_v32 = vrot.slane %v287_v24, 4  ;;  %v166_v33 = vrot.slane %v163_v25, 4 }
  0x8d   :  { %v225_v26 = vpop.permute.xlu0 %224  ;;  %v196_v27 = vpop.permute.xlu1 %195 }
  0x8e   :  { %v198_v28 = vrot.slane %v196_v27, 4  ;;  %v228_v44 = vrot.slane %v225_v26, 4 }
  0x90   :  { %v202_v29 = vsel %vm200_vm0, %v196_v27, %v198_v28 }
  0x91   :  { %206 = vst [vmem:[#allocation2 + $0x38] sm:$0xc] %v202_v29  ;;  %v289_v30 = vpop.permute.xlu0 %288  ;;  %v165_v31 = vpop.permute.xlu1 %164 }
  0x92   :  { %v291_v34 = vrot.slane %v289_v30, 4  ;;  %v167_v35 = vrot.slane %v165_v31, 4 }
  0x94   :  { %v292_v36 = vsel %vm74_vm1, %v290_v32, %v291_v34  ;;  %v295_v37 = vsel %vm293_vm2, %v289_v30, %v291_v34  ;;  %v168_v38 = vsel %vm74_vm1, %v166_v33, %v167_v35  ;;  %v171_v39 = vsel %vm169_vm3, %v165_v31, %v167_v35 }
  0x95   :  { %v294_v40 = vsel %vm293_vm2, %v287_v24, %v292_v36  ;;  %299 = vst [vmem:[#allocation2 + $0x68] sm:$0x3] %v295_v37  ;;  %v170_v41 = vsel %vm169_vm3, %v163_v25, %v168_v38  ;;  %175 = vst [vmem:[#allocation2 + $0x38] sm:$0x3] %v171_v39  ;;  %v194_v42 = vpop.permute.xlu0 %193  ;;  %v227_v43 = vpop.permute.xlu1 %226 }
  0x96   :  { %298 = vst [vmem:[#allocation2 + $0x60] sm:$0x33] %v294_v40  ;;  %174 = vst [vmem:[#allocation2 + $0x30] sm:$0x33] %v170_v41  ;;  %v197_v45 = vrot.slane %v194_v42, 4  ;;  %v229_v46 = vrot.slane %v227_v43, 4 }
  0x98   :  { %v199_v47 = vsel %vm74_vm1, %v197_v45, %v198_v28  ;;  %v230_v48 = vsel %vm74_vm1, %v228_v44, %v229_v46  ;;  %v233_v49 = vsel %vm231_vm4, %v227_v43, %v229_v46  ;;  %v1077_v45 = vld [vmem:[%s1110_s1] sm:$0xf]  ;;  %s976_s1 = smov [#allocation6]  }
  0x99   :  { %v201_v50 = vsel %vm200_vm0, %v194_v42, %v199_v47  ;;  %v232_v51 = vsel %vm231_vm4, %v225_v26, %v230_v48  ;;  %237 = vst [vmem:[#allocation2 + $0x50] sm:$0x3] %v233_v49  ;;  %v256_v52 = vpop.permute.xlu0 %255  ;;  %v258_v53 = vpop.permute.xlu1 %257  ;;  %s835_s29 = sshll.u32 %s976_s1, 4  ;;  %s836_s29 = int_to_ptr.vmem [resolvable:$true] %s835_s29 }
  0x9a   :  { %205 = vst [vmem:[#allocation2 + $0x30] sm:$0xcc] %v201_v50  ;;  %236 = vst [vmem:[#allocation2 + $0x48] sm:$0x33] %v232_v51  ;;  %v259_v54 = vrot.slane %v256_v52, 4  ;;  %v260_v55 = vrot.slane %v258_v53, 4  ;;  %p944_p6 = scmp.lt.s32.totalorder %s836_s29, %s836_s29 }
  0x9b   :  { %s939_s30 = scalar_lea.vmem %s836_s29, 768 }
  0x9c   :  { %v261_v56 = vsel %vm74_vm1, %v259_v54, %v260_v55  ;;  %v264_v57 = vsel %vm262_vm5, %v258_v53, %v260_v55  ;;  %p940_p5 = scmp.ne.s32.totalorder %s836_s29, %s939_s30  ;;  %p945_p7 = scmp.lt.s32.totalorder %s939_s30, %s939_s30 }
  0x9d   :  { %v263_v58 = vsel %vm262_vm5, %v256_v52, %v261_v56  ;;  %268 = vst [vmem:[#allocation2 + $0x50] sm:$0xc] %v264_v57  ;;  %v71_v59 = vpop.permute.xlu1 %70  ;;  %v69_v60 = vpop.permute.xlu0 %68  ;;  %v575_v61 = vld [vmem:[#allocation2 + $0x60] sm:$0x33] }
  0x9e   :  { %267 = vst [vmem:[#allocation2 + $0x48] sm:$0xcc] %v263_v58  ;;  %v73_v62 = vrot.slane %v71_v59, 4  ;;  %v72_v63 = vrot.slane %v69_v60, 4  ;;  %v864_v0 = vcombine.high %v575_v61, %v575_v61  ;;  %v863_v1 = vcombine.low %v575_v61, %v575_v61  ;;  %p946_p8 = por %p945_p7, %p944_p6 }
  0xa0   :  { %v78_v2 = vsel %vm76_vm6, %v71_v59, %v73_v62  ;;  %v75_v3 = vsel %vm74_vm1, %v72_v63, %v73_v62  ;;  %869 = vmatprep.subr.msk.bf16.mxu0 %vm663_vm7, %v864_v0  ;;  %v665_v4 = vsel %vm663_vm7, %v863_v1, 0  ;;  %p947_p9 = pnand %p946_p8, %p940_p5 }
  0xa1   :  { %82 = vst [vmem:[#allocation2 + $0x8] sm:$0xc] %v78_v2  ;;  %v77_v5 = vsel %vm76_vm6, %v69_v60, %v75_v3  ;;  %693 = vmatpush1.bf16.msra.mxu0 %v665_v4  ;;  %v103_v6 = vpop.permute.xlu1 %102  ;;  %v101_v7 = vpop.permute.xlu0 %100 }
  0xa2   :  { %81 = vst [vmem:[#allocation2] sm:$0xcc] %v77_v5  ;;  %v105_v8 = vrot.slane %v103_v6, 4  ;;  %v104_v9 = vrot.slane %v101_v7, 4 }
  0xa4   :  { %v109_v10 = vsel %vm107_vm8, %v103_v6, %v105_v8  ;;  %v106_v11 = vsel %vm74_vm1, %v104_v9, %v105_v8 }
  0xa5   :  { %113 = vst [vmem:[#allocation2 + $0x20] sm:$0x3] %v109_v10  ;;  %v108_v12 = vsel %vm107_vm8, %v101_v7, %v106_v11  ;;  %v134_v13 = vpop.permute.xlu1 %133  ;;  %v132_v14 = vpop.permute.xlu0 %131  ;;  %v898_v15 = vld [vmem:[#allocation2 + $0x34] ss:$24 sps:$4 sm:$0xff]   ;;  %v900_v16 = vld [vmem:[#allocation2 + $0x30] ss:$24 sps:$4 sm:$0xff]  }
  0xa6   :  { %112 = vst [vmem:[#allocation2 + $0x18] sm:$0x33] %v108_v12  ;;  %v136_v17 = vrot.slane %v134_v13, 4  ;;  %v135_v19 = vrot.slane %v132_v14, 4  ;;  %694 = vmatprep.subr.bf16.mxu0 %v898_v15 }
  0xa7   :  { %695 = vmatpush1.bf16.msra.mxu0 %v900_v16 }
  0xa8   :  { %v140_v20 = vsel %vm138_vm9, %v134_v13, %v136_v17  ;;  %v137_v21 = vsel %vm74_vm1, %v135_v19, %v136_v17 }
  0xa9   :  { %144 = vst [vmem:[#allocation2 + $0x20] sm:$0xc] %v140_v20  ;;  %v139_v22 = vsel %vm138_vm9, %v132_v14, %v137_v21  ;;  %v552_v23 = vpop.permute.xlu1 %551  ;;  %v550_v24 = vpop.permute.xlu0 %549 }
  0xaa   :  { %143 = vst [vmem:[#allocation2 + $0x18] sm:$0xcc] %v139_v22  ;;  %v554_v25 = vrot.slane %v552_v23, 4  ;;  %v553_v26 = vrot.slane %v550_v24, 4 }
  0xac   :  { %v557_v27 = vsel %vm293_vm2, %v552_v23, %v554_v25  ;;  %v555_v28 = vsel %vm74_vm1, %v553_v26, %v554_v25  ;;  %v913_v26 = vld [vmem:[#allocation2 + $0x38] ss:$24 sps:$4 sm:$0xff]  }
  0xad   :  { %561 = vst [vmem:[#allocation2 + $0x74] sm:$0x3] %v557_v27  ;;  %v556_v29 = vsel %vm293_vm2, %v550_v24, %v555_v28  ;;  %v432_v30 = vpop.permute.xlu1 %431  ;;  %v430_v31 = vpop.permute.xlu0 %429 }
  0xae   :  { %560 = vst [vmem:[#allocation2 + $0x6c] sm:$0x33] %v556_v29  ;;  %v434_v32 = vrot.slane %v432_v30, 4  ;;  %v433_v33 = vrot.slane %v430_v31, 4 }
  0xb0   :  { %v437_v34 = vsel %vm169_vm3, %v432_v30, %v434_v32  ;;  %v435_v35 = vsel %vm74_vm1, %v433_v33, %v434_v32 }
  0xb1   :  { %441 = vst [vmem:[#allocation2 + $0x44] sm:$0x3] %v437_v34  ;;  %v436_v36 = vsel %vm169_vm3, %v430_v31, %v435_v35  ;;  %v462_v37 = vpop.permute.xlu1 %461  ;;  %v460_v38 = vpop.permute.xlu0 %459  ;;  %v901_v39 = vld [vmem:[#allocation2 + $0x4] ss:$24 sps:$4 sm:$0xff]   ;;  %v903_v40 = vld [vmem:[#allocation2] ss:$24 sps:$4 sm:$0xff]  }
  0xb2   :  { %440 = vst [vmem:[#allocation2 + $0x3c] sm:$0x33] %v436_v36  ;;  %v464_v41 = vrot.slane %v462_v37, 4  ;;  %v463_v42 = vrot.slane %v460_v38, 4  ;;  %696 = vmatprep.subr.bf16.mxu0 %v901_v39 }
  0xb3   :  { %697 = vmatpush1.bf16.msra.mxu0 %v903_v40 }
  0xb4   :  { %v467_v43 = vsel %vm200_vm0, %v462_v37, %v464_v41  ;;  %v465_v44 = vsel %vm74_vm1, %v463_v42, %v464_v41 }
  0xb5   :  { %471 = vst [vmem:[#allocation2 + $0x44] sm:$0xc] %v467_v43  ;;  %v466_v46 = vsel %vm200_vm0, %v460_v38, %v465_v44  ;;  %v492_v47 = vpop.permute.xlu1 %491  ;;  %v490_v48 = vpop.permute.xlu0 %489  ;;  %v576_v49 = vld [vmem:[#allocation2 + $0x68] sm:$0x33]  ;;  %v577_v50 = vld [vmem:[#allocation2 + $0x70] sm:$0x33] }
  0xb6   :  { %470 = vst [vmem:[#allocation2 + $0x3c] sm:$0xcc] %v466_v46  ;;  %v494_v51 = vrot.slane %v492_v47, 4  ;;  %v493_v52 = vrot.slane %v490_v48, 4  ;;  %v866_v53 = vcombine.high %v576_v49, %v576_v49  ;;  %v868_v54 = vcombine.high %v577_v50, %v577_v50  ;;  %870 = vmatmul.mubr.msk.bf16.vlgmr.msra.gmra.mxu0 %vm659_vm10, %v1077_v45 }
  0xb7   :  { %v865_v55 = vcombine.low %v576_v49, %v576_v49  ;;  %v867_v56 = vcombine.low %v577_v50, %v577_v50  ;;  %796 = vmatprep.mubr.bf16.mxu0 %v975_v18 }
  0xb8   :  { %v497_v57 = vsel %vm231_vm4, %v492_v47, %v494_v51  ;;  %v495_v58 = vsel %vm74_vm1, %v493_v52, %v494_v51  ;;  %871 = vmatprep.subr.msk.bf16.mxu1 %vm663_vm7, %v866_v53  ;;  %873 = vmatprep.subr.msk.bf16.mxu0 %vm663_vm7, %v868_v54 }
  0xb9   :  { %501 = vst [vmem:[#allocation2 + $0x5c] sm:$0x3] %v497_v57  ;;  %v496_v59 = vsel %vm231_vm4, %v490_v48, %v495_v58  ;;  %v522_v60 = vpop.permute.xlu1 %521  ;;  %v671_v61 = vsel %vm663_vm7, %v865_v55, 0  ;;  %v520_v62 = vpop.permute.xlu0 %519  ;;  %v677_v63 = vsel %vm663_vm7, %v867_v56, 0 }
  0xba   :  { %500 = vst [vmem:[#allocation2 + $0x54] sm:$0x33] %v496_v59  ;;  %v524_v0 = vrot.slane %v522_v60, 4  ;;  %734 = vmatpush1.bf16.msra.mxu1 %v671_v61  ;;  %v523_v1 = vrot.slane %v520_v62, 4  ;;  %775 = vmatpush1.bf16.msra.mxu0 %v677_v63 }
  0xbc   :  { %v527_v2 = vsel %vm262_vm5, %v522_v60, %v524_v0  ;;  %v525_v3 = vsel %vm74_vm1, %v523_v1, %v524_v0 }
  0xbd   :  { %531 = vst [vmem:[#allocation2 + $0x5c] sm:$0xc] %v527_v2  ;;  %v526_v4 = vsel %vm262_vm5, %v520_v62, %v525_v3  ;;  %v342_v5 = vpop.permute.xlu1 %341  ;;  %v340_v6 = vpop.permute.xlu0 %339 }
  0xbe   :  { %530 = vst [vmem:[#allocation2 + $0x54] sm:$0xcc] %v526_v4  ;;  %v344_v7 = vrot.slane %v342_v5, 4  ;;  %v343_v8 = vrot.slane %v340_v6, 4 }
  0xc0   :  { %v347_v9 = vsel %vm76_vm6, %v342_v5, %v344_v7  ;;  %v345_v18 = vsel %vm74_vm1, %v343_v8, %v344_v7 }
  0xc1   :  { %351 = vst [vmem:[#allocation2 + $0x14] sm:$0xc] %v347_v9  ;;  %v346_v10 = vsel %vm76_vm6, %v340_v6, %v345_v18  ;;  %v372_v11 = vpop.permute.xlu1 %371  ;;  %v370_v12 = vpop.permute.xlu0 %369 }
  0xc2   :  { %350 = vst [vmem:[#allocation2 + $0xc] sm:$0xcc] %v346_v10  ;;  %v374_v13 = vrot.slane %v372_v11, 4  ;;  %v373_v14 = vrot.slane %v370_v12, 4 }
  0xc4   :  { %v377_v15 = vsel %vm107_vm8, %v372_v11, %v374_v13  ;;  %v375_v16 = vsel %vm74_vm1, %v373_v14, %v374_v13  ;;  %v912_v25 = vld [vmem:[#allocation2 + $0x44] ss:$24 sps:$4 sm:$0xff]  }
  0xc5   :  { %381 = vst [vmem:[#allocation2 + $0x2c] sm:$0x3] %v377_v15  ;;  %v376_v17 = vsel %vm107_vm8, %v370_v12, %v375_v16  ;;  %v402_v19 = vpop.permute.xlu1 %401  ;;  %v400_v20 = vpop.permute.xlu0 %399  ;;  %v908_v21 = vld [vmem:[#allocation2 + $0x3c] ss:$24 sps:$4 sm:$0xff]   ;;  %v910_v24 = vld [vmem:[#allocation2 + $0x40] ss:$24 sps:$4 sm:$0xff]   ;;  %776 = vmatprep.subr.bf16.mxu0 %v912_v25 }
  0xc6   :  { %380 = vst [vmem:[#allocation2 + $0x24] sm:$0x33] %v376_v17  ;;  %v404_v22 = vrot.slane %v402_v19, 4  ;;  %v403_v23 = vrot.slane %v400_v20, 4  ;;  %735 = vmatprep.subr.bf16.mxu1 %v908_v21  ;;  %777 = vmatpush1.bf16.msra.mxu0 %v910_v24 }
  0xc7   :  { %736 = vmatpush1.bf16.msra.mxu1 %v913_v26 }
  0xc8   :  { %v407_v27 = vsel %vm138_vm9, %v402_v19, %v404_v22  ;;  %v405_v28 = vsel %vm74_vm1, %v403_v23, %v404_v22 }
  0xc9   :  { %411 = vst [vmem:[#allocation2 + $0x2c] sm:$0xc] %v407_v27  ;;  %v406_v29 = vsel %vm138_vm9, %v400_v20, %v405_v28  ;;  %v564_v30 = vld [vmem:[#allocation2 + $0x8] sm:$0xff] }
  0xca   :  { %410 = vst [vmem:[#allocation2 + $0x24] sm:$0xcc] %v406_v29 }
  0xd0   :  { %v918_v34 = vld [vmem:[#allocation2 + $0x14] ss:$24 sps:$4 sm:$0xff]  }
  0xd1   :  { %v567_v31 = vld [vmem:[#allocation2 + $0x20] sm:$0xff]  ;;  %v916_v33 = vld [vmem:[#allocation2 + $0x10] ss:$24 sps:$4 sm:$0xff]   ;;  %778 = vmatprep.subr.bf16.mxu0 %v918_v34 }
  0xd2   :  { %v914_v32 = vld [vmem:[#allocation2 + $0xc] ss:$24 sps:$4 sm:$0xff]   ;;  %v853_v35 = vcombine.low %v564_v30, %v567_v31  ;;  %779 = vmatpush1.bf16.msra.mxu0 %v916_v33  ;;  %v582_v36 = vpop.permute.xlu0 %581 }
  0xd3   :  { %737 = vmatprep.subr.bf16.mxu1 %v914_v32 }
  0xd4   :  { %738 = vmatpush1.bf16.msra.mxu1 %v853_v35 }
  0xd5   :  { %874 = vmatmul.mubr.msk.bf16.vlgmr.msra.gmra.mxu0 %vm659_vm10, %v1077_v45 }
  0xd7   :  { %872 = vmatmul.mubr.msk.bf16.vlgmr.msra.gmra.mxu1 %vm659_vm10, %v1077_v45 }
 0x176   :  { %v716_v37 = vpop.f32.mrf.mxu0 }
 0x177   :  { %v717_v38 = vadd.f32 %v716_v37, %v582_v36 }
 0x178   :  { %v718_v39 = vpop.f32.mrf.mxu0 }
 0x179   :  { %v719_v40 = vadd.f32 %v718_v39, %v582_v36  ;;  %vm805_vm11 = vcmp.gt.f32.partialorder %v717_v38, 0.0  ;;  %v811_v41 = vmul.f32 0.2, %v717_v38 }
 0x17a   :  { %v720_v42 = vpop.f32.mrf.mxu0 }
 0x17b   :  { %vm806_vm12 = vcmp.gt.f32.partialorder %v719_v40, 0.0  ;;  %v812_v43 = vmul.f32 0.2, %v719_v40  ;;  %v817_v44 = vsel %vm805_vm11, %v717_v38, %v811_v41 }
 0x17c   :  { %823 = vst [vmem:[#allocation6] sm:$0xff] %v817_v44  ;;  %v721_v46 = vpop.f32.mrf.mxu0 }
 0x17d   :  { %v818_v47 = vsel %vm806_vm12, %v719_v40, %v812_v43 }
 0x17e   :  { %824 = vst [vmem:[#allocation6 + $0x8] sm:$0xff] %v818_v47 }
 0x195   :  { %v798_v50 = vpop.f32.mrf.mxu0 }
 0x196   :  { %v799_v51 = vadd.f32 %v798_v50, %v582_v36 }
 0x197   :  { %v757_v48 = vpop.f32.mrf.mxu1  ;;  %v800_v54 = vpop.f32.mrf.mxu0 }
 0x198   :  { %v758_v49 = vadd.f32 %v757_v48, %v582_v36  ;;  %vm809_vm14 = vcmp.gt.f32.partialorder %v799_v51, 0.0  ;;  %v815_v55 = vmul.f32 0.2, %v799_v51  ;;  %v801_v56 = vadd.f32 %v800_v54, %v582_v36 }
 0x199   :  { %v759_v45 = vpop.f32.mrf.mxu1  ;;  %v802_v60 = vpop.f32.mrf.mxu0 }
 0x19a   :  { %vm807_vm13 = vcmp.gt.f32.partialorder %v758_v49, 0.0  ;;  %v813_v52 = vmul.f32 0.2, %v758_v49  ;;  %v760_v53 = vadd.f32 %v759_v45, %v582_v36  ;;  %v821_v61 = vsel %vm809_vm14, %v799_v51, %v815_v55 }
 0x19b   :  { %v761_v57 = vpop.f32.mrf.mxu1  ;;  %vm810_vm0 = vcmp.gt.f32.partialorder %v801_v56, 0.0  ;;  %v816_v62 = vmul.f32 0.2, %v801_v56  ;;  %828 = vst [vmem:[#allocation6 + $0x20] sm:$0xff] %v821_v61  ;;  %v803_v1 = vpop.f32.mrf.mxu0 }
 0x19c   :  { %v819_v58 = vsel %vm807_vm13, %v758_v49, %v813_v52  ;;  %vm808_vm15 = vcmp.gt.f32.partialorder %v760_v53, 0.0  ;;  %v814_v59 = vmul.f32 0.2, %v760_v53 }
 0x19d   :  { %825 = vst [vmem:[#allocation6 + $0x10] sm:$0xff] %v819_v58  ;;  %v762_v63 = vpop.f32.mrf.mxu1  ;;  %v822_v2 = vsel %vm810_vm0, %v801_v56, %v816_v62 }
 0x19e   :  { %v820_v0 = vsel %vm808_vm15, %v760_v53, %v814_v59  ;;  %829 = vst [vmem:[#allocation6 + $0x28] sm:$0xff] %v822_v2 }
 0x19f   :  { %827 = vst [vmem:[#allocation6 + $0x18] sm:$0xff] %v820_v0 }
 0x1a0   :  { %950 = shalt.err (!%p947_p9)
}
 0x1a1   :  { %s977_s4 = smov 384   ;;  %s978_s5 = smov 24  }
 0x1a2   :  { %841 = dma.vmem_to_hbm [thread:$0]  %s836_s29, 768, %s1112_s3, [#allocation5], %s977_s4, %s977_s4, %s978_s5  }
 0x1a3   :  { %961 = dma.done.wait [#allocation5], 768  }
 0x1a4   :  { %962 = vsyncadd [#allocation5], 4294966528 }
 0x1a5   :  { %845 = vsyncpa [#allocation4], 1 }
 0x1a6   :  { %846 = vsyncpa [#allocation5], 1 }

</bundles_post_ra>
